<compile_context>
chip_gen: v6e
topology: v6e:2x2x1
jax: 0.10.0
libtpu: 0.0.40
codegen_flags: <defaults>
</compile_context>

<pallas_src>
import functools
import math

import jax
import jax.numpy as jnp
from jax.experimental import pallas as pl
from jax.experimental.pallas import tpu as pltpu

_MIB = 1024 * 1024


def _vmem_capacity_bytes():
    """Per-core VMEM capacity; conservative (v7x) fallback if query fails."""
    try:
        return int(pltpu.get_tpu_info().vmem_capacity_bytes)
    except Exception:
        return 64 * _MIB


def _pick_lane_fold(c, hw):
    """Smallest g with (g*c) % 128 == 0 and hw % g == 0 -> lane-dense blocks."""
    if c % 128 == 0:
        return 1
    g = 128 // math.gcd(c, 128)
    if hw % g == 0 and g * c <= 1024:
        return g
    return 1


def _largest_aligned_divisor(n, sub, target):
    """Largest multiple of `sub` that divides n and is <= target (or None)."""
    t0 = (target // sub) * sub
    for t in range(t0, 0, -sub):
        if n % t == 0:
            return t
    return None


def _collapse_groups(ssq, groups, channels):
    """Sum the g interleaved channel groups -> true per-channel sum-of-squares."""
    ssq_c = ssq[:, 0:channels]
    for j in range(1, groups):
        ssq_c = ssq_c + ssq[:, j * channels:(j + 1) * channels]
    return ssq_c


# ---------------------------------------------------------------------------
# Fused single-pass kernel: whole per-batch folded slab resident in VMEM.
# ---------------------------------------------------------------------------
def _grn_fused_kernel(x_ref, gb_ref, o_ref, *, groups, channels, compute_dtype):
    xf = x_ref[...].astype(jnp.float32)                       # (hw_f, lanes)
    ssq = jnp.sum(xf * xf, axis=0, keepdims=True)             # (1, lanes)
    ssq_c = _collapse_groups(ssq, groups, channels)           # (1, C)
    gx = jnp.sqrt(ssq_c)
    nx = gx / (jnp.mean(gx, axis=-1, keepdims=True) + 1e-6)   # (1, C)
    nx_full = nx if groups == 1 else jnp.concatenate([nx] * groups, axis=-1)
    scale = gb_ref[0:1, :] * nx_full + 1.0                    # gamma*Nx + 1
    beta = gb_ref[1:2, :]
    if compute_dtype == jnp.float32:
        o_ref[...] = (xf * scale + beta).astype(o_ref.dtype)
    else:
        o_ref[...] = (x_ref[...].astype(compute_dtype) * scale.astype(compute_dtype)
                      + beta.astype(compute_dtype)).astype(o_ref.dtype)


# ---------------------------------------------------------------------------
# Tiled two-pass fallback (slabs too big for VMEM residency).
# ---------------------------------------------------------------------------
def _grn_stats_kernel(x_ref, gb_ref, sb_ref, *, groups, channels):
    """Pass 1: accumulate ssq; finalize -> row0 = gamma*Nx+1, row1 = beta."""
    k = pl.program_id(1)

    @pl.when(k == 0)
    def _init():
        sb_ref[...] = jnp.zeros_like(sb_ref)

    xf = x_ref[...].astype(jnp.float32)                        # (thw, lanes)
    sb_ref[0:1, :] = sb_ref[0:1, :] + jnp.sum(xf * xf, axis=0, keepdims=True)

    @pl.when(k == pl.num_programs(1) - 1)
    def _finalize():
        ssq_c = _collapse_groups(sb_ref[0:1, :], groups, channels)
        gx = jnp.sqrt(ssq_c)
        nx = gx / (jnp.mean(gx, axis=-1, keepdims=True) + 1e-6)
        nx_full = nx if groups == 1 else jnp.concatenate([nx] * groups, axis=-1)
        sb_ref[0:1, :] = gb_ref[0:1, :] * nx_full + 1.0
        sb_ref[1:2, :] = gb_ref[1:2, :]


def _grn_apply_kernel(x_ref, sb_ref, o_ref, *, compute_dtype):
    """Pass 2: out = x * scale + beta  (== gamma*(x*Nx) + beta + x)."""
    scale = sb_ref[0:1, :].astype(compute_dtype)
    beta = sb_ref[1:2, :].astype(compute_dtype)
    o_ref[...] = (x_ref[...].astype(compute_dtype) * scale + beta).astype(o_ref.dtype)


# ---------------------------------------------------------------------------
# Wrapper.
# ---------------------------------------------------------------------------
def grn_forward(x_nhwc, gamma, beta, *, _force_two_pass=False, _tile_target=None):
    """GRN forward.  x_nhwc: (N, H, W, C); gamma/beta: (1, 1, 1, C)."""
    n, h, w, c = x_nhwc.shape
    hw = h * w
    in_dtype = x_nhwc.dtype
    itemsize = jnp.dtype(in_dtype).itemsize
    compute_dtype = jnp.bfloat16 if in_dtype == jnp.bfloat16 else jnp.float32
    sub = 16 if in_dtype == jnp.bfloat16 else 8   # sublane alignment

    # Lane folding: pack g spatial rows into lanes so blocks are 128-lane dense.
    g = _pick_lane_fold(c, hw)
    lanes = g * c
    hw_f = hw // g

    x_folded = x_nhwc.reshape(n, hw_f, lanes)
    gamma_row = jnp.tile(gamma.reshape(1, c).astype(jnp.float32), (1, g))
    beta_row = jnp.tile(beta.reshape(1, c).astype(jnp.float32), (1, g))
    gb = jnp.concatenate([gamma_row, beta_row], axis=0)        # (2, lanes) f32

    vmem_cap = _vmem_capacity_bytes()
    budget = vmem_cap // 3
    slab = hw_f * lanes
    # per-batch fused estimate: double-buffered in + out slabs + ~2 f32 temps
    fused_est = slab * (4 * itemsize + 8)

    # ---- fused resident-slab path (single kernel, 2x HBM traffic) ----
    if (not _force_two_pass) and fused_est <= budget:
        vmem_limit = int(min(vmem_cap * 7 // 8, max(fused_est * 5 // 4, 32 * _MIB)))
        out_folded = pl.pallas_call(
            functools.partial(_grn_fused_kernel, groups=g, channels=c,
                              compute_dtype=compute_dtype),
            out_shape=jax.ShapeDtypeStruct((n, hw_f, lanes), in_dtype),
            grid_spec=pltpu.PrefetchScalarGridSpec(
                num_scalar_prefetch=0,
                grid=(n,),
                in_specs=[
                    pl.BlockSpec((pl.Squeezed(), hw_f, lanes), lambda b: (b, 0, 0)),
                    pl.BlockSpec((2, lanes), lambda b: (0, 0)),
                ],
                out_specs=pl.BlockSpec((pl.Squeezed(), hw_f, lanes),
                                       lambda b: (b, 0, 0)),
            ),
            compiler_params=pltpu.CompilerParams(
                dimension_semantics=("parallel",),
                vmem_limit_bytes=vmem_limit),
        )(x_folded, gb)
        return out_folded.reshape(n, h, w, c)

    # ---- tiled two-pass fallback ----
    if _tile_target is None:
        thw_cap_raw = budget // max(1, lanes * (4 * itemsize + 8))
        thw_cap = max(sub, (thw_cap_raw // sub) * sub)
        target = min(2048, thw_cap)
    else:
        target = max(sub, (_tile_target // sub) * sub)

    pad = 0
    if hw_f <= target:
        thw = hw_f                      # full-extent block: always layout-legal
    else:
        thw = _largest_aligned_divisor(hw_f, sub, target)
        if thw is None:
            # cdiv-safe: zero-pad the tail tile (zeros don't change the stats).
            thw = target
            pad = pl.cdiv(hw_f, thw) * thw - hw_f
            x_folded = jnp.pad(x_folded, ((0, 0), (0, pad), (0, 0)))
    hw_p = hw_f + pad
    n_tiles = hw_p // thw

    tile_est = thw * lanes * (4 * itemsize + 8)
    vmem_limit = int(min(vmem_cap * 7 // 8, max(tile_est * 5 // 4, 32 * _MIB)))

    # Pass 1: statistics (spatial axis is the reduction -> "arbitrary").
    sb = pl.pallas_call(
        functools.partial(_grn_stats_kernel, groups=g, channels=c),
        out_shape=jax.ShapeDtypeStruct((n, 2, lanes), jnp.float32),
        grid_spec=pltpu.PrefetchScalarGridSpec(
            num_scalar_prefetch=0,
            grid=(n, n_tiles),
            in_specs=[
                pl.BlockSpec((pl.Squeezed(), thw, lanes), lambda b, k: (b, k, 0)),
                pl.BlockSpec((2, lanes), lambda b, k: (0, 0)),
            ],
            out_specs=pl.BlockSpec((pl.Squeezed(), 2, lanes),
                                   lambda b, k: (b, 0, 0)),
        ),
        compiler_params=pltpu.CompilerParams(
            dimension_semantics=("parallel", "arbitrary"),
            vmem_limit_bytes=vmem_limit),
    )(x_folded, gb)

    # Pass 2: elementwise FMA, fully parallel grid.
    out_folded = pl.pallas_call(
        functools.partial(_grn_apply_kernel, compute_dtype=compute_dtype),
        out_shape=jax.ShapeDtypeStruct((n, hw_p, lanes), in_dtype),
        grid_spec=pltpu.PrefetchScalarGridSpec(
            num_scalar_prefetch=0,
            grid=(n, n_tiles),
            in_specs=[
                pl.BlockSpec((pl.Squeezed(), thw, lanes), lambda b, k: (b, k, 0)),
                pl.BlockSpec((pl.Squeezed(), 2, lanes), lambda b, k: (b, 0, 0)),
            ],
            out_specs=pl.BlockSpec((pl.Squeezed(), thw, lanes),
                                   lambda b, k: (b, k, 0)),
        ),
        compiler_params=pltpu.CompilerParams(
            dimension_semantics=("parallel", "parallel"),
            vmem_limit_bytes=vmem_limit),
    )(x_folded, sb)

    if pad:
        out_folded = out_folded[:, :hw_f, :]
    return out_folded.reshape(n, h, w, c)


def grn_reference(x_nhwc, gamma, beta):
    """Pure-JAX reference mirroring the PyTorch forward exactly."""
    xf = x_nhwc.astype(jnp.float32)
    gx = jnp.sqrt(jnp.sum(xf * xf, axis=(1, 2), keepdims=True))     # (N,1,1,C)
    nx = gx / (jnp.mean(gx, axis=-1, keepdims=True) + 1e-6)         # (N,1,1,C)
    return (gamma * (xf * nx) + beta + xf).astype(x_nhwc.dtype)


if __name__ == "__main__":
    key = jax.random.PRNGKey(0)
    kx, kg, kb = jax.random.split(key, 3)

    def make(n, h, w, c):
        x = jax.random.normal(kx, (n, h, w, c), dtype=jnp.float32)
        # Module __init__ uses zeros; use small deterministic random values so
        # the full compute path is exercised.
        gamma = 0.1 * jax.random.normal(kg, (1, 1, 1, c), dtype=jnp.float32)
        beta = 0.1 * jax.random.normal(kb, (1, 1, 1, c), dtype=jnp.float32)
        return x, gamma, beta

    def check(x, gamma, beta, **kw):
        out = jax.block_until_ready(grn_forward(x, gamma, beta, **kw))
        ref = grn_reference(x, gamma, beta)
        assert out.shape == ref.shape
        assert jnp.allclose(out, ref, atol=1e-5, rtol=1e-5), "mismatch vs reference"

    # 1) Fused resident-slab path (C=32 -> lane fold g=4, 128 lanes).
    x, gamma, beta = make(2, 16, 16, 32)
    check(x, gamma, beta)

    # 2) Fused path with generalized fold (ConvNeXt-V2 width 96 -> g=4, 384 lanes).
    x, gamma, beta = make(1, 8, 8, 96)
    check(x, gamma, beta)

    # 3) Tiled two-pass fallback: multi-tile spatial reduction.
    x, gamma, beta = make(2, 16, 16, 32)
    check(x, gamma, beta, _force_two_pass=True, _tile_target=16)

    # 4) Tiled fallback with an awkward spatial extent -> cdiv/zero-pad tail tile.
    x, gamma, beta = make(1, 9, 9, 32)
    check(x, gamma, beta, _force_two_pass=True, _tile_target=16)

    print("KERNEL_OK")
</pallas_src>

<mosaic_0001>
module attributes {stable_mosaic.version = 11 : i64} {
  func.func @_grn_fused_kernel(%arg0: i32, %arg1: memref<1x64x128xf32, #tpu.memory_space<vmem>>, %arg2: memref<2x128xf32, #tpu.memory_space<vmem>>, %arg3: memref<1x64x128xf32, #tpu.memory_space<vmem>>) attributes {dimension_semantics = [#tpu.dimension_semantics<parallel>], iteration_bounds = array<i64: 2>, scalar_prefetch = 0 : i64, scratch_operands = 0 : i64, tpu.core_type = #tpu.core_type<tc>, window_params = [{transform_indices = @transform_0, window_bounds = array<i64: 1, 64, 128>}, {pipeline_mode = #tpu.pipeline_mode<synchronous>, transform_indices = @transform_1, window_bounds = array<i64: 2, 128>}, {transform_indices = @transform_2, window_bounds = array<i64: 1, 64, 128>}]} {
    %c0 = arith.constant 0 : index
    %c0_0 = arith.constant 0 : index
    %c0_1 = arith.constant 0 : index
    %0 = vector.load %arg1[%c0, %c0_0, %c0_1] : memref<1x64x128xf32, #tpu.memory_space<vmem>>, vector<1x64x128xf32>
    %1 = vector.shape_cast %0 : vector<1x64x128xf32> to vector<64x128xf32>
    %2 = arith.mulf %1, %1 : vector<64x128xf32>
    %cst = arith.constant dense<0.000000e+00> : vector<128xf32>
    %3 = vector.multi_reduction <add>, %2, %cst [0] : vector<64x128xf32> to vector<128xf32>
    %4 = vector.shape_cast %3 : vector<128xf32> to vector<1x128xf32>
    %5 = vector.extract_strided_slice %4 {offsets = [0, 0], sizes = [1, 32], strides = [1, 1]} : vector<1x128xf32> to vector<1x32xf32>
    %6 = vector.extract_strided_slice %4 {offsets = [0, 32], sizes = [1, 32], strides = [1, 1]} : vector<1x128xf32> to vector<1x32xf32>
    %7 = arith.addf %5, %6 : vector<1x32xf32>
    %8 = vector.extract_strided_slice %4 {offsets = [0, 64], sizes = [1, 32], strides = [1, 1]} : vector<1x128xf32> to vector<1x32xf32>
    %9 = arith.addf %7, %8 : vector<1x32xf32>
    %10 = vector.extract_strided_slice %4 {offsets = [0, 96], sizes = [1, 32], strides = [1, 1]} : vector<1x128xf32> to vector<1x32xf32>
    %11 = arith.addf %9, %10 : vector<1x32xf32>
    %12 = math.sqrt %11 : vector<1x32xf32>
    %cst_2 = arith.constant dense<0.000000e+00> : vector<1xf32>
    %13 = vector.multi_reduction <add>, %12, %cst_2 [1] : vector<1x32xf32> to vector<1xf32>
    %14 = vector.shape_cast %13 : vector<1xf32> to vector<1x1xf32>
    %cst_3 = arith.constant 3.200000e+01 : f32
    %15 = vector.broadcast %cst_3 : f32 to vector<1x1xf32>
    %16 = arith.divf %14, %15 : vector<1x1xf32>
    %cst_4 = arith.constant 9.99999997E-7 : f32
    %17 = vector.broadcast %cst_4 : f32 to vector<1x1xf32>
    %18 = arith.addf %16, %17 : vector<1x1xf32>
    %19 = vector.broadcast %18 : vector<1x1xf32> to vector<1x32xf32>
    %20 = arith.divf %12, %19 : vector<1x32xf32>
    %21 = tpu.concatenate %20, %20, %20, %20 in 1 : vector<1x32xf32>, vector<1x32xf32>, vector<1x32xf32>, vector<1x32xf32> -> vector<1x128xf32>
    %c0_5 = arith.constant 0 : index
    %c0_6 = arith.constant 0 : index
    %22 = vector.load %arg2[%c0_5, %c0_6] : memref<2x128xf32, #tpu.memory_space<vmem>>, vector<1x128xf32>
    %23 = arith.mulf %22, %21 : vector<1x128xf32>
    %cst_7 = arith.constant 1.000000e+00 : f32
    %24 = vector.broadcast %cst_7 : f32 to vector<1x128xf32>
    %25 = arith.addf %23, %24 : vector<1x128xf32>
    %c1 = arith.constant 1 : index
    %c0_8 = arith.constant 0 : index
    %26 = vector.load %arg2[%c1, %c0_8] : memref<2x128xf32, #tpu.memory_space<vmem>>, vector<1x128xf32>
    %27 = vector.broadcast %25 : vector<1x128xf32> to vector<64x128xf32>
    %28 = arith.mulf %1, %27 : vector<64x128xf32>
    %29 = vector.broadcast %26 : vector<1x128xf32> to vector<64x128xf32>
    %30 = arith.addf %28, %29 : vector<64x128xf32>
    %c0_9 = arith.constant 0 : index
    %c0_10 = arith.constant 0 : index
    %c0_11 = arith.constant 0 : index
    %31 = vector.load %arg3[%c0_9, %c0_10, %c0_11] : memref<1x64x128xf32, #tpu.memory_space<vmem>>, vector<1x64x128xf32>
    %32 = vector.shape_cast %31 : vector<1x64x128xf32> to vector<64x128xf32>
    %33 = vector.shape_cast %30 : vector<64x128xf32> to vector<1x64x128xf32>
    tpu.vector_store %arg3[%c0_9, %c0_10, %c0_11], %33 {strides = array<i32>} : memref<1x64x128xf32, #tpu.memory_space<vmem>>, vector<1x64x128xf32>,
    return
  }
  func.func @transform_0(%arg0: i32) -> (i32, i32, i32) {
    %c0_i32 = arith.constant 0 : i32
    %c0_i32_0 = arith.constant 0 : i32
    %c0_i32_1 = arith.constant 0 : i32
    return %arg0, %c0_i32, %c0_i32_0 : i32, i32, i32
  }
  func.func @transform_1(%arg0: i32) -> (i32, i32) {
    %c0_i32 = arith.constant 0 : i32
    %c0_i32_0 = arith.constant 0 : i32
    %c0_i32_1 = arith.constant 0 : i32
    return %c0_i32, %c0_i32_0 : i32, i32
  }
  func.func @transform_2(%arg0: i32) -> (i32, i32, i32) {
    %c0_i32 = arith.constant 0 : i32
    %c0_i32_0 = arith.constant 0 : i32
    %c0_i32_1 = arith.constant 0 : i32
    return %arg0, %c0_i32, %c0_i32_0 : i32, i32, i32
  }
}

</mosaic_0001>

<bundles_post_ra>
// kernel: tpu_custom_call.1
= control target key start
LH: loop header
LB: loop body
LE: loop exit
PB: predicated region body
PF: predicated region fallthrough
CT: control target
= control target key end

     0   :  { %7 = vsyncpa [#allocation3], 0  ;;  %s845_s0 = inlined_call_operand.hbm [shape: f32[2,64,128], index: 0, kind: input, shape index: {}]   ;;  %s846_s1 = inlined_call_operand.hbm [shape: f32[2,128], index: 1, kind: input, shape index: {}]   ;;  %s847_s2 = inlined_call_operand.hbm [shape: f32[2,64,128], index: 2, kind: output, shape index: {}]  }
   0x1   :  { %9 = vsyncpa [#allocation3 + $0x1], 0 }
   0x2   :  { %10 = vsyncpa [#allocation6], 0 }
   0x3   :  { %11 = vsyncpa [#allocation4], 0 }
   0x4   :  { %13 = vsyncpa [#allocation4 + $0x1], 0  ;;  %s618_s9 = smov 0   ;;  %s620_s10 = smov 0  }
   0x5   :  { %s622_s11 = smov 0   ;;  %s624_s12 = smov 0  }
   0x6 LB: > { %s639_s13 = sadd.s32 4294967295, %s591_s12   ;;  %s382_s14 = sadd.s32 4294967294, %s591_s12   ;;  %s591_s12 = sphi %s624_s12, %s870_s12   ;;  %s587_s11 = sphi %s622_s11, %s869_s11   ;;  %s583_s10 = sphi %s620_s10, %s868_s10   ;;  %s579_s9 = sphi %s618_s9, %s867_s9  }
   0x7   : > { %s643_s15 = sadd.s32 1, %s591_s12   ;;  %s26_s16 = sadd.s32 1, %s587_s11 }
   0x8   : > { %s23_s17 = ssub.s32 %s591_s12, %s643_s15  ;;  %p33_p0 = scmp.ne.s32.totalorder %s587_s11, %s583_s10 }
   0x9   : > { %p24_p1 = scmp.eq.s32.totalorder %s23_s17, 0  ;;  %p34_p2 = scmp.eq.s32.totalorder %s591_s12, 0 }
   0xa   : > { %p39_p3 = scmp.ne.s32.totalorder %s583_s10, %s579_s9  ;;  %p848_p4 = scmp.eq.s32.totalorder %s639_s13, 0 }
   0xb   : > { %s655_s18 = scalar_select %p24_p1, %s587_s11, %s26_s16  }
   0xc   : > { %p657_p5 = por %p34_p2, %p33_p0  ;;  %p663_p6 = por %p848_p4, %p39_p3 }
   0xd   : > { %p84_p7 = scmp.eq.s32.totalorder %s639_s13, 1  ;;  %p90_p8 = scmp.eq.s32.totalorder %s382_s14, 1 }
   0xe   : > { %s853_s20 = scalar_select %p663_p6, 1, 0 }
   0xf   : > { %p383_p9 = scmp.ge.s32.totalorder %s591_s12, 1  ;;  %p97_p10 = scmp.lt.s32.totalorder %s591_s12, 3 }
  0x10   : > { %p670_p11 = por %p84_p7, %p33_p0  ;;  %p674_p12 = por %p90_p8, %p39_p3 }
  0x11   : > { %p678_p13 = pnand %p383_p9, %p97_p10  ;;  %s593_s24 = smov [#allocation5]  }
  0x12   : > { %s854_s21 = scalar_select %p670_p11, 1, 0 }
  0x13   : > { %s855_s22 = scalar_select %p674_p12, 1, 0 }
  0x14   : > { %s856_s23 = scalar_select %p678_p13, 1, 0 }
  0x15   : > { %p409_p2 = pneg %p678_p13  ;;  %s110_s25 = sshll.u32 %s593_s24, 4  ;;  %s111_s25 = int_to_ptr.vmem [resolvable:$true] %s110_s25 }
  0x16   : > { %p422_p4 = scmp.lt.s32.totalorder %s591_s12, 2  ;;  %p857_p0 = scmp.eq.s32.totalorder %s639_s13, 0 }
  0x17   : > { %s121_s27 = sand.u32 1, %s587_s11   ;;  %s480_s30 = scalar_lea.vmem %s111_s25, 32 }
  0x18   : > { %p688_p7 = pnand %p409_p2, %p857_p0  ;;  %p695_p3 = pnand %p422_p4, %p657_p5 }
  0x19   : > { %s386_s29 = sshll.u32 %s121_s27, 6  ;;  %p481_p9 = scmp.ne.s32.totalorder %s111_s25, %s480_s30 }
  0x1a   : > { %p471_p8 = pneg %p688_p7  ;;  %p488_p12 = scmp.lt.s32.totalorder %s111_s25, %s111_s25 }
  0x1b   : > { %p489_p11 = scmp.lt.s32.totalorder %s480_s30, %s480_s30 }
  0x1c   : > { %p483_p10 = pnand %p481_p9, %p471_p8 }
  0x1d   : > { %p490_p2 = por %p489_p11, %p488_p12 }
  0x1e   : > { %p484_p1 = pneg %p483_p10 }
  0x20   : > { %p491_p0 = pnand %p490_p2, %p484_p1 }
  0x22   : > { %494 = shalt.err (!%p491_p0)
}
  0x23   : > { %412 = dma.hbm_to_vmem [thread:$0]  (!%p688_p7), %s846_s1, 32, %s111_s25, [#allocation6]  }
  0x24   : > { %s399_s5 = sshll.u32 %s591_s12, 10  ;;  %s125_s6 = scalar_lea.vmem [#allocation2], %s386_s29 }
  0x25   : > { %s132_s7 = sshll.u32 %s125_s6, 4  ;;  %s710_s16 = scalar_lea.hbm %s845_s0, %s399_s5  ;;  %s712_s7 = int_to_ptr.vmem [resolvable:$true] %s132_s7 }
  0x26   : > { %s714_s17 = scalar_lea.sflag [#allocation3], %s121_s27  ;;  %s495_s19 = scalar_lea.hbm %s710_s16, 1024 }
  0x27   : > { %p496_p4 = scmp.ne.s32.totalorder %s710_s16, %s495_s19  ;;  %p497_p5 = pneg %p695_p3 }
  0x28   : > { %s500_s26 = scalar_lea.hbm %s845_s0, 2048  ;;  %p501_p1 = scmp.lt.s32.totalorder %s710_s16, %s845_s0 }
  0x29   : > { %p498_p11 = pnand %p497_p5, %p496_p4  ;;  %p502_p7 = scmp.lt.s32.totalorder %s500_s26, %s495_s19 }
  0x2b   : > { %p499_p12 = pneg %p498_p11  ;;  %p503_p8 = por %p502_p7, %p501_p1 }
  0x2d   : > { %p504_p9 = pnand %p503_p8, %p499_p12 }
  0x2f   : > { %507 = shalt.err (!%p504_p9)
}
  0x30   : > { %s508_s27 = scalar_lea.vmem %s712_s7, 1024  ;;  %s594_s3 = smov [#allocation2]  }
  0x31   : > { %p509_p10 = scmp.ne.s32.totalorder %s712_s7, %s508_s27  ;;  %s513_s4 = sshll.u32 %s594_s3, 4  ;;  %s514_s4 = int_to_ptr.vmem [resolvable:$false] %s513_s4 }
  0x32   : > { %s515_s5 = scalar_lea.vmem %s514_s4, 2048  ;;  %p516_p4 = scmp.lt.s32.totalorder %s712_s7, %s514_s4 }
  0x33   : > { %p511_p2 = pnand %p509_p10, %p497_p5  ;;  %p517_p11 = scmp.lt.s32.totalorder %s515_s5, %s508_s27 }
  0x35   : > { %p512_p0 = pneg %p511_p2  ;;  %p518_p6 = por %p517_p11, %p516_p4 }
  0x37   : > { %p519_p13 = pnand %p518_p6, %p512_p0 }
  0x39   : > { %522 = shalt.err (!%p519_p13)
}
  0x3a   : > { %s595_s6 = smov 128   ;;  %s596_s8 = smov 8  }
  0x3b   : > { %416 = dma.hbm_to_vmem [thread:$0]  (!%p695_p3), %s710_s16, 1024, %s712_s7, %s714_s17, %s595_s6, %s595_s6, %s596_s8  }
  0x3c   : > { %p860_p5 = scmp.ne.s32.totalorder %s856_s23, 0 }
  0x3d   : > { %s738_s14 = sand.u32 (!%p860_p5), 1, %s583_s10   ;;  %p861_p6 = scmp.ne.s32.totalorder (!%p860_p5), %s853_s20, 0 }
  0x3e   : > { %144 = sbr.rel (%p860_p5) target bundleno = 551 (0x227), region = 28  ;;  %s390_s19 = sshll.u32 (!%p860_p5), %s738_s14, 6 }
  0x3f   : > { %s147_s24 = scalar_lea.sflag (!%p860_p5), [#allocation3], %s738_s14  ;;  %s150_s25 = scalar_lea.vmem (!%p860_p5), [#allocation2], %s390_s19 }
  0x43   : > { %566 = dma.done.wait (%p861_p6), %s147_s24, 1024  }
  0x44   : > { %568 = vsyncadd (%p861_p6), %s147_s24, 4294966272  ;;  %p862_p13 = scmp.eq.s32.totalorder %s639_s13, 0 }
  0x46   : > { %570 = dma.done.wait (%p862_p13), [#allocation6], 32   ;;  %p863_p3 = pmov %p862_p13 }
  0x47   : > { %v752_v0 = vld [vmem:[%s150_s25] sm:$0xff]  ;;  %v754_v1 = vld [vmem:[%s150_s25 + $0x8] sm:$0xff]  ;;  %v756_v2 = vld [vmem:[%s150_s25 + $0x10] sm:$0xff]  ;;  %s597_s20 = smov 96   ;;  %s598_s23 = smov 32   ;;  %vm224_vm1 = vcmask 253952   ;;  %v253_v47 = vlaneseq }
  0x48   : > { %572 = vsyncadd (%p863_p3), [#allocation6], 4294967264  ;;  %v758_v3 = vld [vmem:[%s150_s25 + $0x18] sm:$0xff]  ;;  %v183_v4 = vmul.f32 %v752_v0, %v752_v0  ;;  %v184_v5 = vmul.f32 %v754_v1, %v754_v1  ;;  %v185_v6 = vmul.f32 %v756_v2, %v756_v2  ;;  %v766_v7 = vld [vmem:[%s150_s25 + $0x20] sm:$0xff]  ;;  %s599_s28 = smov 64   ;;  %vm243_vm3 = vcmask 261120  }
  0x49   : > { %v186_v8 = vmul.f32 %v758_v3, %v758_v3  ;;  %v770_v10 = vld [vmem:[%s150_s25 + $0x28] sm:$0xff]  ;;  %v187_v11 = vmul.f32 %v766_v7, %v766_v7  ;;  %v774_v13 = vld [vmem:[%s150_s25 + $0x30] sm:$0xff]  ;;  %v778_v16 = vld [vmem:[%s150_s25 + $0x38] sm:$0xff]  ;;  %vm245_vm4 = vcmask 523264   ;;  %vm247_vm5 = vcmask 785408   ;;  %s400_s7 = sshll.u32 %s639_s13, 10 }
  0x4a   : > { %v191_v9 = vadd.f32 %v184_v5, %v183_v4  ;;  %v188_v14 = vmul.f32 %v770_v10, %v770_v10  ;;  %v189_v17 = vmul.f32 %v774_v13, %v774_v13  ;;  %v190_v19 = vmul.f32 %v778_v16, %v778_v16  ;;  %v249_v51 = vld [vmem:[#allocation5] sm:$0x1]  ;;  %v393_v59 = vld [vmem:[#allocation5 + $0x1] ss:$0 sm:$0xff]  ;;  %s174_s16 = scalar_lea.vmem [#allocation7], %s390_s19  ;;  %s800_s29 = scalar_lea.hbm %s847_s2, %s400_s7 }
  0x4b   : > { %v254_v49 = vshrl.u32 %v253_v47, 7  ;;  %s299_s17 = sshll.u32 %s174_s16, 4  ;;  %s286_s30 = scalar_lea.sflag [#allocation4], %s738_s14  ;;  %s802_s17 = int_to_ptr.vmem [resolvable:$true] %s299_s17 }
  0x4c   : > { %v192_v12 = vadd.f32 %v191_v9, %v185_v6  ;;  %s523_s27 = scalar_lea.vmem %s802_s17, 1024  ;;  %p864_p1 = scmp.ne.s32.totalorder %s854_s21, 0 }
  0x4d   : > { %v255_v55 = vsub.s32 0, %v254_v49  ;;  %p524_p12 = scmp.ne.s32.totalorder %s802_s17, %s523_s27  ;;  %s600_s3 = smov [#allocation7]  }
  0x4e   : > { %v193_v15 = vadd.f32 %v192_v12, %v186_v8  ;;  %s527_s4 = sshll.u32 %s600_s3, 4  ;;  %s528_s4 = int_to_ptr.vmem [resolvable:$false] %s527_s4 }
  0x4f   : > { %p525_p7 = pnand %p524_p12, %p864_p1  ;;  %s529_s5 = scalar_lea.vmem %s528_s4, 2048 }
  0x50   : > { %v194_v18 = vadd.f32 %v193_v15, %v187_v11  ;;  %p530_p9 = scmp.lt.s32.totalorder %s802_s17, %s528_s4  ;;  %p531_p10 = scmp.lt.s32.totalorder %s529_s5, %s523_s27 }
  0x51   : > { %p526_p8 = pneg %p525_p7 }
  0x52   : > { %v195_v20 = vadd.f32 %v194_v18, %v188_v14  ;;  %p532_p2 = por %p531_p10, %p530_p9 }
  0x54   : > { %v196_v21 = vadd.f32 %v195_v20, %v189_v17  ;;  %p533_p0 = pnand %p532_p2, %p526_p8 }
  0x56   : > { %v197_v22 = vadd.f32 %v196_v21, %v190_v19 }
  0x58   : > { %v198_v23 = vrot.slane %v197_v22, 4 }
  0x5a   : > { %v199_v24 = vadd.f32 %v198_v23, %v197_v22 }
  0x5c   : > { %v200_v25 = vrot.slane %v199_v24, 2 }
  0x5e   : > { %v201_v26 = vadd.f32 %v200_v25, %v199_v24 }
  0x60   : > { %v202_v27 = vrot.slane %v201_v26, 1 }
  0x62   : > { %v203_v28 = vadd.f32 %v202_v27, %v201_v26 }
  0x64   : > { %205 = vrot.lane.b32.xlu0 %v203_v28, %s597_s20  ;;  %213 = vrot.lane.b32.xlu1 %v203_v28, %s598_s23 }
  0x68   : > { %209 = vrot.lane.b32.xlu0 %v203_v28, %s599_s28 }
  0xd6   : > { %v206_v29 = vpop.permute.xlu0 %205  ;;  %v214_v32 = vpop.permute.xlu1 %213 }
  0xd7   : > { %v208_v30 = vadd.f32 %v206_v29, %v203_v28 }
  0xda   : > { %v210_v31 = vpop.permute.xlu0 %209 }
  0xdb   : > { %v212_v33 = vadd.f32 %v210_v31, %v208_v30 }
  0xdd   : > { %v216_v34 = vadd.f32 %v214_v32, %v212_v33 }
  0xdf   : > { %465 = vrsqrt.f32 %v216_v34  ;;  %vm219_vm0 = vcmp.eq.f32.partialorder %v216_v34, inf  ;;  %v222_v37 = vand.u32 2147483648, %v216_v34  ;;  %vm221_vm2 = vcmp.eq.f32.partialorder %v216_v34, 0.0 }
  0xec   : > { %v466_v35 = vpop.eup %465 }
  0xed   : > { %v218_v36 = vmul.f32 %v466_v35, %v216_v34 }
  0xef   : > { %v220_v38 = vsel %vm219_vm0, %v216_v34, %v218_v36 }
  0xf0   : > { %v223_v39 = vsel %vm221_vm2, %v222_v37, %v220_v38 }
  0xf1   : > { %v225_v40 = vsel %vm224_vm1, %v223_v39, 0.0 }
  0xf2   : > { %226 = vadd.xlane.f32.xlu1 %v225_v40 }
 0x17b   : > { %v227_v41 = vpop.xlane.xlu1 %226 }
 0x17c   : > { %v229_v42 = vmul.f32 0.03125, %v227_v41 }
 0x17e   : > { %v230_v43 = vadd.f32 1e-06, %v229_v42 }
 0x180   : > { %467 = vrcp.f32 %v230_v43 }
 0x18d   : > { %v468_v44 = vpop.eup %467 }
 0x18e   : > { %v232_v45 = vmul.f32 %v468_v44, %v223_v39 }
 0x190   : > { %234 = vrot.lane.b32.xlu0 %v232_v45, %s598_s23 }
 0x194   : > { %237 = vrot.lane.b32.xlu0 %v232_v45, %s599_s28 }
 0x198   : > { %240 = vrot.lane.b32.xlu0 %v232_v45, %s597_s20 }
 0x202   : > { %v235_v46 = vpop.permute.xlu0 %234 }
 0x203   : > { %v244_v50 = vsel %vm243_vm3, %v232_v45, %v235_v46 }
 0x206   : > { %v238_v48 = vpop.permute.xlu0 %237 }
 0x207   : > { %v246_v52 = vsel %vm245_vm4, %v244_v50, %v238_v48 }
 0x20a   : > { %v241_v53 = vpop.permute.xlu0 %240 }
 0x20b   : > { %v248_v54 = vsel %vm247_vm5, %v246_v52, %v241_v53 }
 0x20c   : > { %v250_v56 = vmul.f32 %v249_v51, %v248_v54 }
 0x20e   : > { %v251_v57 = vadd.f32 1.0, %v250_v56 }
 0x210   : > { %v256_v58 = vrot.slane %v251_v57, %v255_v55 }
 0x212   : > { %v257_v60 = vmul.f32 %v256_v58, %v752_v0  ;;  %v258_v61 = vmul.f32 %v256_v58, %v754_v1  ;;  %v259_v62 = vmul.f32 %v256_v58, %v756_v2  ;;  %v260_v63 = vmul.f32 %v256_v58, %v758_v3 }
 0x213   : > { %v261_v4 = vmul.f32 %v256_v58, %v766_v7  ;;  %v262_v5 = vmul.f32 %v256_v58, %v770_v10  ;;  %v263_v6 = vmul.f32 %v256_v58, %v774_v13  ;;  %v264_v8 = vmul.f32 %v256_v58, %v778_v16 }
 0x214   : > { %v269_v9 = vadd.f32 %v393_v59, %v257_v60  ;;  %v270_v11 = vadd.f32 %v393_v59, %v258_v61  ;;  %v271_v12 = vadd.f32 %v393_v59, %v259_v62  ;;  %v272_v14 = vadd.f32 %v393_v59, %v260_v63 }
 0x215   : > { %v273_v0 = vadd.f32 %v393_v59, %v261_v4  ;;  %v274_v1 = vadd.f32 %v393_v59, %v262_v5  ;;  %v275_v2 = vadd.f32 %v393_v59, %v263_v6  ;;  %v276_v3 = vadd.f32 %v393_v59, %v264_v8 }
 0x216   : > { %277 = vst [vmem:[%s174_s16] sm:$0xff] %v269_v9  ;;  %278 = vst [vmem:[%s174_s16 + $0x8] sm:$0xff] %v270_v11 }
 0x217   : > { %279 = vst [vmem:[%s174_s16 + $0x10] sm:$0xff] %v271_v12  ;;  %280 = vst [vmem:[%s174_s16 + $0x18] sm:$0xff] %v272_v14 }
 0x218   : > { %281 = vst [vmem:[%s174_s16 + $0x20] sm:$0xff] %v273_v0  ;;  %282 = vst [vmem:[%s174_s16 + $0x28] sm:$0xff] %v274_v1 }
 0x219   : > { %283 = vst [vmem:[%s174_s16 + $0x30] sm:$0xff] %v275_v2  ;;  %284 = vst [vmem:[%s174_s16 + $0x38] sm:$0xff] %v276_v3 }
 0x21a   : > { %536 = shalt.err (!%p533_p0)
}
 0x21b   : > { %s537_s6 = scalar_lea.hbm %s800_s29, 1024  ;;  %s541_s24 = scalar_lea.hbm %s847_s2, 2048 }
 0x21c   : > { %p538_p4 = scmp.ne.s32.totalorder %s800_s29, %s537_s6  ;;  %p542_p6 = scmp.lt.s32.totalorder %s800_s29, %s847_s2 }
 0x21d   : > { %p543_p13 = scmp.lt.s32.totalorder %s541_s24, %s537_s6 }
 0x21e   : > { %p539_p11 = pnand %p538_p4, %p864_p1 }
 0x21f   : > { %p544_p3 = por %p543_p13, %p542_p6 }
 0x220   : > { %p540_p5 = pneg %p539_p11 }
 0x222   : > { %p545_p12 = pnand %p544_p3, %p540_p5 }
 0x224   : > { %548 = shalt.err (!%p545_p12)
}
 0x225   : > { %s601_s23 = smov 128   ;;  %s602_s28 = smov 8  }
 0x226   : > { %407 = dma.vmem_to_hbm [thread:$0]  (%p864_p1), %s802_s17, 1024, %s800_s29, %s286_s30, %s601_s23, %s601_s23, %s602_s28  }
 0x227 PF: > { %s314_s7 = sand.u32 1, %s579_s9   ;;  %p865_p7 = scmp.ne.s32.totalorder %s855_s22, 0 }
 0x228   : > { %p866_p8 = scmp.ge.s32.totalorder %s591_s12, 2  ;;  %s315_s16 = scalar_lea.sflag [#allocation4], %s314_s7 }
 0x22a   : > { %p418_p9 = pnand %p866_p8, %p865_p7 }
 0x22c   : > { %p419_p10 = pneg %p418_p9 }
 0x22e   : > { %574 = dma.done.wait (%p419_p10), %s315_s16, 1024  }
 0x22f   : > { %576 = vsyncadd (%p419_p10), %s315_s16, 4294966272  ;;  %p16_p2 = scmp.ge.s32.totalorder %s643_s15, 4   ;;  %s867_s9 = smov %s583_s10 }
 0x230   : > { %s868_s10 = smov %s587_s11  ;;  %s869_s11 = smov %s655_s18 }
 0x231   : > { %s870_s12 = smov %s643_s15  ;;  %18 = sbr.rel (!%p16_p2) target bundleno = 6 (0x6), region = 77 }
 0x236   :  { %320 = vsyncpa [#allocation3], 1 }
 0x237   :  { %322 = vsyncpa [#allocation3 + $0x1], 1 }
 0x238   :  { %323 = vsyncpa [#allocation6], 1 }
 0x239   :  { %324 = vsyncpa [#allocation4], 1 }
 0x23a   :  { %326 = vsyncpa [#allocation4 + $0x1], 1 }

</bundles_post_ra>
